<compile_context>
chip_gen: v7x
topology: tpu7x:2x2x1
jax: 0.10.0
libtpu: 0.0.40
codegen_flags: <defaults>
</compile_context>

<pallas_src>
import jax
import jax.numpy as jnp
from jax.experimental import pallas as pl
from jax.experimental.pallas import tpu as pltpu


# ----------------------------------------------------------------------------- helpers
def _round_up(x: int, n: int) -> int:
    return ((x + n - 1) // n) * n


def _cdiv(a: int, b: int) -> int:
    return -(-a // b)


def _num_tensorcores() -> int:
    """TensorCores reachable from one Pallas program via a 'parallel' grid axis."""
    try:
        kind = jax.devices()[0].device_kind.lower()
    except Exception:
        return 1
    # v4 / v5p megacore and v7x expose 2 TensorCores; v5e / v6e have 1.
    return 2 if any(tag in kind for tag in ("v4", "v5p", "v7", "7x")) else 1


def _vmem_capacity_bytes() -> int:
    try:
        return int(pltpu.get_tpu_info().vmem_capacity_bytes)
    except Exception:
        return 64 << 20  # conservative fallback: v7x has the smallest VMEM/TC


def _pick_row_tile(m: int, e: int, *, num_cores: int, vmem_limit_bytes: int) -> int:
    """Largest sublane-aligned row tile (<= 1024 rows) that
       * fits a conservative VMEM budget (half the scoped limit; includes the
         double-buffered x/out tiles, the f32 (TM, 3E) intermediates, and the
         resident bf16 weights), and
       * is no larger than one grid step per TensorCore needs, so both v7x TCs
         get work while single-TC v5e/v6e don't pay extra per-step overhead.
    The caller pads M up to a multiple of the returned tile."""
    budget = vmem_limit_bytes // 2
    resident = 2 * (e * 3 * e * 2) * 2            # w1.T + w2.T, bf16, 2 pipeline bufs

    def fits(tm: int) -> bool:
        per_step = (2 * tm * e * 2                # x tile, bf16, double-buffered
                    + 2 * tm * e * 4              # out tile, f32, double-buffered
                    + 2 * tm * 3 * e * 4)         # f32 intermediates (h + temps)
        return resident + per_step <= budget

    cap = min(1024, _round_up(max(8, _cdiv(m, max(1, num_cores))), 8))
    for tm in (1024, 512, 256, 128, 64, 32, 16, 8):
        if tm <= cap and fits(tm):
            return tm
    return 8


# ----------------------------------------------------------------------------- kernel
def _silu(x):
    # silu(x) = x * sigmoid(x) = x / (1 + exp(-x)).
    # exp and the approximate reciprocal both run on the EUP slot, so the MXU
    # (not the single EUP / VPU) remains the binding unit after the bf16 switch.
    return x * pl.reciprocal(1.0 + jnp.exp(-x), approx=True)


def _mlp_kernel(x_ref, w1_ref, b1_ref, w2_ref, b2_ref, o_ref):
    # x_ref:  (TM, E)   bf16 row tile of flattened tokens
    # w1_ref: (E, 3E)   bf16 linear_1.weight.T   (VMEM-resident)
    # b1_ref: (1, 3E)   f32  linear_1.bias       (VMEM-resident)
    # w2_ref: (3E, E)   bf16 linear_2.weight.T   (VMEM-resident)
    # b2_ref: (1, E)    f32  linear_2.bias       (VMEM-resident)
    # o_ref:  (TM, E)   output (original input dtype)
    x = x_ref[...]

    # linear_1: bf16 operands on the MXU, f32 accumulate; bias + SiLU in f32.
    h = jnp.dot(x, w1_ref[...], preferred_element_type=jnp.float32) + b1_ref[...]
    h = _silu(h)

    # linear_2: feed the activation back to the MXU in bf16, f32 accumulate.
    y = jnp.dot(h.astype(jnp.bfloat16), w2_ref[...],
                preferred_element_type=jnp.float32) + b2_ref[...]
    y = _silu(y)

    o_ref[...] = y.astype(o_ref.dtype)


# ----------------------------------------------------------------------------- wrapper
def prepare_mlp_params(w1, b1, w2, b2):
    """One-time weight prep (outside the hot path): transpose torch-layout
    weights to (in, out) and cast to bf16 for the MXU; biases stay f32 and are
    reshaped to (1, N) so they broadcast over the row tile."""
    w1_t = jnp.asarray(w1).T.astype(jnp.bfloat16)           # (E, 3E)
    w2_t = jnp.asarray(w2).T.astype(jnp.bfloat16)           # (3E, E)
    b1_2 = jnp.asarray(b1, jnp.float32).reshape(1, -1)      # (1, 3E)
    b2_2 = jnp.asarray(b2, jnp.float32).reshape(1, -1)      # (1, E)
    return w1_t, b1_2, w2_t, b2_2


@jax.jit
def mlp_forward(x, w1_t, b1, w2_t, b2):
    """x: (B, S, E) float32; (w1_t, b1, w2_t, b2) as from prepare_mlp_params."""
    B, S, E = x.shape
    M = B * S

    num_cores = _num_tensorcores()
    vmem_limit = min(_vmem_capacity_bytes(), 64 << 20)   # explicit scoped-VMEM limit
    tm = _pick_row_tile(M, E, num_cores=num_cores, vmem_limit_bytes=vmem_limit)

    m_pad = _round_up(M, tm)
    x2 = x.reshape(M, E).astype(jnp.bfloat16)             # bf16 at the kernel boundary
    if m_pad != M:
        x2 = jnp.pad(x2, ((0, m_pad - M), (0, 0)))        # zero rows, sliced off below

    grid = (m_pad // tm,)

    out2 = pl.pallas_call(
        _mlp_kernel,
        out_shape=jax.ShapeDtypeStruct((m_pad, E), x.dtype),
        grid_spec=pltpu.PrefetchScalarGridSpec(
            num_scalar_prefetch=0,
            grid=grid,
            in_specs=[
                pl.BlockSpec((tm, E), lambda i: (i, 0)),        # x row tile
                pl.BlockSpec((E, 3 * E), lambda i: (0, 0)),     # w1.T  (resident)
                pl.BlockSpec((1, 3 * E), lambda i: (0, 0)),     # b1    (resident)
                pl.BlockSpec((3 * E, E), lambda i: (0, 0)),     # w2.T  (resident)
                pl.BlockSpec((1, E), lambda i: (0, 0)),         # b2    (resident)
            ],
            out_specs=pl.BlockSpec((tm, E), lambda i: (i, 0)),
        ),
        compiler_params=pltpu.CompilerParams(
            dimension_semantics=("parallel",),   # row tiles shard across TCs (v7x)
            vmem_limit_bytes=vmem_limit,
        ),
    )(x2, w1_t, b1, w2_t, b2)

    if m_pad != M:
        out2 = out2[:M]
    return out2.reshape(B, S, E)


def reference(x, w1, b1, w2, b2):
    """Pure-JAX f32 reproduction of the PyTorch forward (torch weight layout)."""
    h = x @ w1.T + b1
    h = h * jax.nn.sigmoid(h)
    y = h @ w2.T + b2
    return y * jax.nn.sigmoid(y)


# ----------------------------------------------------------------------------- demo
if __name__ == "__main__":
    B, S, E = 2, 16, 128          # small, lane-dense (E multiple of 128)
    H = 3 * E

    key = jax.random.PRNGKey(0)
    kx, kw1, kb1, kw2, kb2 = jax.random.split(key, 5)

    x = jax.random.normal(kx, (B, S, E), dtype=jnp.float32)

    # nn.Linear-style uniform(-1/sqrt(fan_in), 1/sqrt(fan_in)) init.
    bound1 = 1.0 / (E ** 0.5)
    w1 = jax.random.uniform(kw1, (H, E), jnp.float32, -bound1, bound1)   # linear_1.weight
    b1 = jax.random.uniform(kb1, (H,), jnp.float32, -bound1, bound1)     # linear_1.bias
    bound2 = 1.0 / (H ** 0.5)
    w2 = jax.random.uniform(kw2, (E, H), jnp.float32, -bound2, bound2)   # linear_2.weight
    b2 = jax.random.uniform(kb2, (E,), jnp.float32, -bound2, bound2)     # linear_2.bias

    params = prepare_mlp_params(w1, b1, w2, b2)   # one-time: transpose + bf16 cast
    out = mlp_forward(x, *params)
    out = jax.block_until_ready(out)

    ref = reference(x, w1, b1, w2, b2)
    assert out.shape == (B, S, E)
    assert out.dtype == x.dtype
    # bf16 MXU inputs (f32 accumulate) + approx reciprocal => relaxed tolerance
    # versus the pure-f32 reference.
    assert jnp.allclose(out, ref, rtol=3e-2, atol=3e-2), "mismatch vs pure-JAX reference"

    print("KERNEL_OK")
</pallas_src>

<mosaic_0001>
module attributes {stable_mosaic.version = 11 : i64} {
  func.func @_mlp_kernel(%arg0: i32, %arg1: memref<32x128xbf16, #tpu.memory_space<vmem>>, %arg2: memref<128x384xbf16, #tpu.memory_space<vmem>>, %arg3: memref<1x384xf32, #tpu.memory_space<vmem>>, %arg4: memref<384x128xbf16, #tpu.memory_space<vmem>>, %arg5: memref<1x128xf32, #tpu.memory_space<vmem>>, %arg6: memref<32x128xf32, #tpu.memory_space<vmem>>) attributes {dimension_semantics = [#tpu.dimension_semantics<parallel>], iteration_bounds = array<i64: 1>, scalar_prefetch = 0 : i64, scratch_operands = 0 : i64, tpu.core_type = #tpu.core_type<tc>, window_params = [{transform_indices = @transform_0, window_bounds = array<i64: 32, 128>}, {pipeline_mode = #tpu.pipeline_mode<synchronous>, transform_indices = @transform_1, window_bounds = array<i64: 128, 384>}, {pipeline_mode = #tpu.pipeline_mode<synchronous>, transform_indices = @transform_2, window_bounds = array<i64: 1, 384>}, {pipeline_mode = #tpu.pipeline_mode<synchronous>, transform_indices = @transform_3, window_bounds = array<i64: 384, 128>}, {pipeline_mode = #tpu.pipeline_mode<synchronous>, transform_indices = @transform_4, window_bounds = array<i64: 1, 128>}, {transform_indices = @transform_5, window_bounds = array<i64: 32, 128>}]} {
    %c0 = arith.constant 0 : index
    %c0_0 = arith.constant 0 : index
    %0 = vector.load %arg1[%c0, %c0_0] : memref<32x128xbf16, #tpu.memory_space<vmem>>, vector<32x128xbf16>
    %c0_1 = arith.constant 0 : index
    %c0_2 = arith.constant 0 : index
    %1 = vector.load %arg2[%c0_1, %c0_2] : memref<128x384xbf16, #tpu.memory_space<vmem>>, vector<128x384xbf16>
    %cst = arith.constant dense<0.000000e+00> : vector<32x384xf32>
    %2 = tpu.matmul %0, %1, %cst {dimension_numbers = #tpu.dot_dimension_numbers<[1], [0], [0], [1], [0, 0, 1, 1], [], []>} : vector<32x128xbf16>, vector<128x384xbf16>, vector<32x384xf32> -> vector<32x384xf32>
    %c0_3 = arith.constant 0 : index
    %c0_4 = arith.constant 0 : index
    %3 = vector.load %arg3[%c0_3, %c0_4] : memref<1x384xf32, #tpu.memory_space<vmem>>, vector<1x384xf32>
    %4 = vector.broadcast %3 : vector<1x384xf32> to vector<32x384xf32>
    %5 = arith.addf %2, %4 : vector<32x384xf32>
    %cst_5 = arith.constant 0.000000e+00 : f32
    %6 = vector.broadcast %cst_5 : f32 to vector<32x384xf32>
    %7 = arith.subf %6, %5 : vector<32x384xf32>
    %8 = math.exp %7 : vector<32x384xf32>
    %cst_6 = arith.constant 1.000000e+00 : f32
    %9 = vector.broadcast %cst_6 : f32 to vector<32x384xf32>
    %10 = arith.addf %9, %8 : vector<32x384xf32>
    %11 = tpu.reciprocal %10 {approx = true} : vector<32x384xf32> -> vector<32x384xf32>
    %12 = arith.mulf %5, %11 : vector<32x384xf32>
    %13 = arith.truncf %12 : vector<32x384xf32> to vector<32x384xbf16>
    %c0_7 = arith.constant 0 : index
    %c0_8 = arith.constant 0 : index
    %14 = vector.load %arg4[%c0_7, %c0_8] : memref<384x128xbf16, #tpu.memory_space<vmem>>, vector<384x128xbf16>
    %cst_9 = arith.constant dense<0.000000e+00> : vector<32x128xf32>
    %15 = tpu.matmul %13, %14, %cst_9 {dimension_numbers = #tpu.dot_dimension_numbers<[1], [0], [0], [1], [0, 0, 1, 1], [], []>} : vector<32x384xbf16>, vector<384x128xbf16>, vector<32x128xf32> -> vector<32x128xf32>
    %c0_10 = arith.constant 0 : index
    %c0_11 = arith.constant 0 : index
    %16 = vector.load %arg5[%c0_10, %c0_11] : memref<1x128xf32, #tpu.memory_space<vmem>>, vector<1x128xf32>
    %17 = vector.broadcast %16 : vector<1x128xf32> to vector<32x128xf32>
    %18 = arith.addf %15, %17 : vector<32x128xf32>
    %cst_12 = arith.constant 0.000000e+00 : f32
    %19 = vector.broadcast %cst_12 : f32 to vector<32x128xf32>
    %20 = arith.subf %19, %18 : vector<32x128xf32>
    %21 = math.exp %20 : vector<32x128xf32>
    %cst_13 = arith.constant 1.000000e+00 : f32
    %22 = vector.broadcast %cst_13 : f32 to vector<32x128xf32>
    %23 = arith.addf %22, %21 : vector<32x128xf32>
    %24 = tpu.reciprocal %23 {approx = true} : vector<32x128xf32> -> vector<32x128xf32>
    %25 = arith.mulf %18, %24 : vector<32x128xf32>
    %c0_14 = arith.constant 0 : index
    %c0_15 = arith.constant 0 : index
    %26 = vector.load %arg6[%c0_14, %c0_15] : memref<32x128xf32, #tpu.memory_space<vmem>>, vector<32x128xf32>
    tpu.vector_store %arg6[%c0_14, %c0_15], %25 {strides = array<i32>} : memref<32x128xf32, #tpu.memory_space<vmem>>, vector<32x128xf32>,
    return
  }
  func.func @transform_0(%arg0: i32) -> (i32, i32) {
    %c0_i32 = arith.constant 0 : i32
    %c0_i32_0 = arith.constant 0 : i32
    return %arg0, %c0_i32 : i32, i32
  }
  func.func @transform_1(%arg0: i32) -> (i32, i32) {
    %c0_i32 = arith.constant 0 : i32
    %c0_i32_0 = arith.constant 0 : i32
    %c0_i32_1 = arith.constant 0 : i32
    return %c0_i32, %c0_i32_0 : i32, i32
  }
  func.func @transform_2(%arg0: i32) -> (i32, i32) {
    %c0_i32 = arith.constant 0 : i32
    %c0_i32_0 = arith.constant 0 : i32
    %c0_i32_1 = arith.constant 0 : i32
    return %c0_i32, %c0_i32_0 : i32, i32
  }
  func.func @transform_3(%arg0: i32) -> (i32, i32) {
    %c0_i32 = arith.constant 0 : i32
    %c0_i32_0 = arith.constant 0 : i32
    %c0_i32_1 = arith.constant 0 : i32
    return %c0_i32, %c0_i32_0 : i32, i32
  }
  func.func @transform_4(%arg0: i32) -> (i32, i32) {
    %c0_i32 = arith.constant 0 : i32
    %c0_i32_0 = arith.constant 0 : i32
    %c0_i32_1 = arith.constant 0 : i32
    return %c0_i32, %c0_i32_0 : i32, i32
  }
  func.func @transform_5(%arg0: i32) -> (i32, i32) {
    %c0_i32 = arith.constant 0 : i32
    %c0_i32_0 = arith.constant 0 : i32
    return %arg0, %c0_i32 : i32, i32
  }
}

</mosaic_0001>

<bundles_post_ra>
// kernel: mlp_forward.1
= control target key start
LH: loop header
LB: loop body
LE: loop exit
PB: predicated region body
PF: predicated region fallthrough
CT: control target
= control target key end

     0   :  { %10 = vsyncpa [#allocation3], 0  ;;  %s1380_s0 = inlined_call_operand.hbm [shape: bf16[32,128], index: 0, kind: input, shape index: {}]   ;;  %s1381_s1 = inlined_call_operand.hbm [shape: bf16[128,384], index: 1, kind: input, shape index: {}]   ;;  %s1382_s2 = inlined_call_operand.hbm [shape: f32[1,384], index: 2, kind: input, shape index: {}]   ;;  %s1383_s3 = inlined_call_operand.hbm [shape: bf16[384,128], index: 3, kind: input, shape index: {}]   ;;  %s1384_s4 = inlined_call_operand.hbm [shape: f32[1,128], index: 4, kind: input, shape index: {}]   ;;  %s1385_s5 = inlined_call_operand.hbm [shape: f32[32,128], index: 5, kind: output, shape index: {}]  }
   0x1   :  { %11 = vsyncpa [#allocation6], 0 }
   0x2   :  { %12 = vsyncpa [#allocation9], 0 }
   0x3   :  { %13 = vsyncpa [#allocation4], 0  ;;  %s1217_s18 = smov [#allocation5]   ;;  %s1077_s22 = scalar_lea.hbm %s1381_s1, 3072 }
   0x4   :  { %s31_s19 = sshll.u32 %s1217_s18, 4  ;;  %p1078_p0 = scmp.ne.s32.totalorder %s1381_s1, %s1077_s22  ;;  %s32_s19 = int_to_ptr.vmem [resolvable:$true] %s31_s19 }
   0x5   :  { %p1081_p1 = scmp.lt.u32.totalorder %s1077_s22, %s1381_s1 }
   0x7   :  { %p1083_p2 = pnand %p1081_p1, %p1078_p0 }
   0x9   :  { %1086 = shalt.err (!%p1083_p2)
}
   0xa   :  { %s1087_s27 = scalar_lea.vmem %s32_s19, 3072  ;;  %p1092_p4 = scmp.lt.s32.totalorder %s32_s19, %s32_s19 }
   0xb   :  { %p1088_p3 = scmp.ne.s32.totalorder %s32_s19, %s1087_s27  ;;  %p1093_p5 = scmp.lt.s32.totalorder %s1087_s27, %s1087_s27 }
   0xd   :  { %p1094_p6 = por %p1093_p5, %p1092_p4 }
   0xf   :  { %p1095_p7 = pnand %p1094_p6, %p1088_p3 }
  0x11   :  { %1098 = shalt.err (!%p1095_p7)
}
  0x12   :  { %s1218_s28 = smov 192   ;;  %s1219_s29 = smov 12  }
  0x13   :  { %37 = dma.hbm_to_vmem [thread:$0]  %s1381_s1, 3072, %s32_s19, [#allocation6], %s1218_s28, %s1218_s28, %s1219_s29  }
  0x14   :  { %s1220_s7 = smov [#allocation8]   ;;  %s1221_s9 = smov [#allocation2]  }
  0x15   :  { %s53_s8 = sshll.u32 %s1220_s7, 4  ;;  %s19_s10 = sshll.u32 %s1221_s9, 4  ;;  %s54_s8 = int_to_ptr.vmem [resolvable:$true] %s53_s8  ;;  %s20_s10 = int_to_ptr.vmem [resolvable:$true] %s19_s10 }
  0x16   :  { %s1099_s13 = scalar_lea.hbm %s1383_s3, 3072 }
  0x17   :  { %p1100_p8 = scmp.ne.s32.totalorder %s1383_s3, %s1099_s13  ;;  %p1103_p9 = scmp.lt.u32.totalorder %s1099_s13, %s1383_s3 }
  0x19   :  { %p1105_p10 = pnand %p1103_p9, %p1100_p8 }
  0x1b   :  { %1108 = shalt.err (!%p1105_p10)
}
  0x1c   :  { %s1109_s1 = scalar_lea.vmem %s54_s8, 3072  ;;  %p1114_p12 = scmp.lt.s32.totalorder %s54_s8, %s54_s8 }
  0x1d   :  { %p1110_p11 = scmp.ne.s32.totalorder %s54_s8, %s1109_s1  ;;  %p1115_p13 = scmp.lt.s32.totalorder %s1109_s1, %s1109_s1 }
  0x1f   :  { %p1116_p0 = por %p1115_p13, %p1114_p12 }
  0x21   :  { %p1117_p1 = pnand %p1116_p0, %p1110_p11 }
  0x23   :  { %1120 = shalt.err (!%p1117_p1)
}
  0x24   :  { %s1222_s18 = smov 64   ;;  %s1223_s19 = smov 4  }
  0x25   :  { %59 = dma.hbm_to_vmem [thread:$0]  %s1383_s3, 3072, %s54_s8, [#allocation9], %s1222_s18, %s1222_s18, %s1223_s19  }
  0x26   :  { %s1121_s24 = scalar_lea.hbm %s1380_s0, 256 }
  0x27   :  { %p1122_p2 = scmp.ne.s32.totalorder %s1380_s0, %s1121_s24  ;;  %p1125_p3 = scmp.lt.u32.totalorder %s1121_s24, %s1380_s0 }
  0x29   :  { %p1127_p4 = pnand %p1125_p3, %p1122_p2 }
  0x2b   :  { %1130 = shalt.err (!%p1127_p4)
}
  0x2c   :  { %s1131_s29 = scalar_lea.vmem %s20_s10, 256  ;;  %p1136_p6 = scmp.lt.s32.totalorder %s20_s10, %s20_s10 }
  0x2d   :  { %p1132_p5 = scmp.ne.s32.totalorder %s20_s10, %s1131_s29  ;;  %p1137_p7 = scmp.lt.s32.totalorder %s1131_s29, %s1131_s29 }
  0x2f   :  { %p1138_p8 = por %p1137_p7, %p1136_p6 }
  0x31   :  { %p1139_p9 = pnand %p1138_p8, %p1132_p5 }
  0x33   :  { %1142 = shalt.err (!%p1139_p9)
}
  0x34   :  { %25 = dma.hbm_to_vmem [thread:$0]  %s1380_s0, 256, %s20_s10, [#allocation3], %s1222_s18, %s1222_s18, %s1223_s19  }
  0x35   :  { %s1224_s6 = smov [#allocation7]   ;;  %s1225_s8 = smov [#allocation10]  }
  0x36   :  { %s44_s7 = sshll.u32 %s1224_s6, 4  ;;  %s66_s9 = sshll.u32 %s1225_s8, 4  ;;  %s45_s7 = int_to_ptr.vmem [resolvable:$true] %s44_s7  ;;  %s67_s9 = int_to_ptr.vmem [resolvable:$true] %s66_s9 }
  0x37   :  { %s1143_s13 = scalar_lea.hbm %s1382_s2, 48 }
  0x38   :  { %p1144_p10 = scmp.ne.s32.totalorder %s1382_s2, %s1143_s13  ;;  %p1147_p11 = scmp.lt.u32.totalorder %s1143_s13, %s1382_s2 }
  0x3a   :  { %p1149_p12 = pnand %p1147_p11, %p1144_p10 }
  0x3c   :  { %1152 = shalt.err (!%p1149_p12)
}
  0x3d   :  { %s1153_s0 = scalar_lea.vmem %s45_s7, 48  ;;  %s1157_s10 = scalar_lea.vmem %s45_s7, 64 }
  0x3e   :  { %p1154_p13 = scmp.ne.s32.totalorder %s45_s7, %s1153_s0  ;;  %p1158_p0 = scmp.lt.s32.totalorder %s45_s7, %s45_s7 }
  0x3f   :  { %p1159_p1 = scmp.lt.s32.totalorder %s1157_s10, %s1153_s0 }
  0x41   :  { %p1160_p2 = por %p1159_p1, %p1158_p0 }
  0x43   :  { %p1161_p3 = pnand %p1160_p2, %p1154_p13 }
  0x45   :  { %1164 = shalt.err (!%p1161_p3)
}
  0x46   :  { %47 = dma.hbm_to_vmem [thread:$0]  %s1382_s2, 48, %s45_s7, [#allocation6]  }
  0x47   :  { %s1165_s21 = scalar_lea.hbm %s1384_s4, 16 }
  0x48   :  { %p1166_p4 = scmp.ne.s32.totalorder %s1384_s4, %s1165_s21  ;;  %p1169_p5 = scmp.lt.u32.totalorder %s1165_s21, %s1384_s4 }
  0x4a   :  { %p1171_p6 = pnand %p1169_p5, %p1166_p4 }
  0x4c   :  { %1174 = shalt.err (!%p1171_p6)
}
  0x4d   :  { %s1175_s26 = scalar_lea.vmem %s67_s9, 16  ;;  %s1179_s27 = scalar_lea.vmem %s67_s9, 32 }
  0x4e   :  { %p1176_p7 = scmp.ne.s32.totalorder %s67_s9, %s1175_s26  ;;  %p1180_p8 = scmp.lt.s32.totalorder %s67_s9, %s67_s9 }
  0x4f   :  { %p1181_p9 = scmp.lt.s32.totalorder %s1179_s27, %s1175_s26 }
  0x51   :  { %p1182_p10 = por %p1181_p9, %p1180_p8 }
  0x53   :  { %p1183_p11 = pnand %p1182_p10, %p1176_p7 }
  0x55   :  { %1186 = shalt.err (!%p1183_p11)
}
  0x56   :  { %69 = dma.hbm_to_vmem [thread:$0]  %s1384_s4, 16, %s67_s9, [#allocation9]  }
  0x57   :  { %1209 = dma.done.wait [#allocation3], 256  }
  0x58   :  { %1210 = vsyncadd [#allocation3], 4294967040 }
  0x59   :  { %1211 = dma.done.wait [#allocation6], 3120  }
  0x5a   :  { %1212 = vsyncadd [#allocation6], 4294964176 }
  0x5b   :  { %1213 = dma.done.wait [#allocation9], 3088  }
  0x5c   :  { %1214 = vsyncadd [#allocation9], 4294964208  ;;  %v1226_v0 = vmov 0   ;;  %v955_v1 = vld [vmem:[#allocation5 + $0x4] ss:$12 sps:$4 sm:$0xff]   ;;  %v988_v26 = vld [vmem:[#allocation2 + $0x8] sm:$0xff]   ;;  %v124_v51 = vlaneseq }
  0x5d   :  { %311 = vmatprep.mubr.bf16.mxu0 %v1226_v0  ;;  %v957_v2 = vld [vmem:[#allocation5 + $0x8] ss:$12 sps:$4 sm:$0xff]   ;;  %279 = vmatprep.subr.bf16.mxu0 %v955_v1  ;;  %v958_v3 = vld [vmem:[#allocation5] ss:$12 sps:$4 sm:$0xff]   ;;  %v962_v6 = vld [vmem:[#allocation5 + $0x18] ss:$12 sps:$4 sm:$0xff]  }
  0x5e   :  { %902 = vmatprep.subr.bf16.mxu1 %v957_v2  ;;  %v959_v4 = vld [vmem:[#allocation5 + $0x1c] ss:$12 sps:$4 sm:$0xff]   ;;  %280 = vmatpush1.bf16.msra.mxu0 %v958_v3  ;;  %v961_v5 = vld [vmem:[#allocation5 + $0x20] ss:$12 sps:$4 sm:$0xff]   ;;  %v965_v8 = vld [vmem:[#allocation5 + $0x38] ss:$12 sps:$4 sm:$0xff]  }
  0x5f   :  { %903 = vmatpush3.bf16.msra.mxu1 %v957_v2  ;;  %281 = vmatprep.subr.bf16.mxu0 %v959_v4  ;;  %v963_v7 = vld [vmem:[#allocation5 + $0x34] ss:$12 sps:$4 sm:$0xff]   ;;  %v966_v9 = vld [vmem:[#allocation5 + $0x30] ss:$12 sps:$4 sm:$0xff]   ;;  %v967_v10 = vld [vmem:[#allocation5 + $0x4c] ss:$12 sps:$4 sm:$0xff]  }
  0x60   :  { %904 = vmatprep.subr.bf16.mxu1 %v961_v5  ;;  %v969_v11 = vld [vmem:[#allocation5 + $0x50] ss:$12 sps:$4 sm:$0xff]   ;;  %v970_v12 = vld [vmem:[#allocation5 + $0x48] ss:$12 sps:$4 sm:$0xff]   ;;  %v974_v15 = vld [vmem:[#allocation5 + $0x60] ss:$12 sps:$4 sm:$0xff]  }
  0x61   :  { %v971_v13 = vld [vmem:[#allocation5 + $0x64] ss:$12 sps:$4 sm:$0xff]   ;;  %v973_v14 = vld [vmem:[#allocation5 + $0x68] ss:$12 sps:$4 sm:$0xff]   ;;  %v977_v17 = vld [vmem:[#allocation5 + $0x80] ss:$12 sps:$4 sm:$0xff]  }
  0x62   :  { %282 = vmatpush1.bf16.msra.mxu0 %v962_v6  ;;  %v975_v16 = vld [vmem:[#allocation5 + $0x7c] ss:$12 sps:$4 sm:$0xff]   ;;  %v978_v18 = vld [vmem:[#allocation5 + $0x78] ss:$12 sps:$4 sm:$0xff]   ;;  %v987_v19 = vld [vmem:[#allocation2] sm:$0xff]   ;;  %v125_v52 = vshrl.u32 %v124_v51, 7 }
  0x63   :  { %905 = vmatpush3.bf16.msra.mxu1 %v961_v5  ;;  %283 = vmatprep.subr.bf16.mxu0 %v963_v7  ;;  %v979_v20 = vld [vmem:[#allocation5 + $0x94] ss:$12 sps:$4 sm:$0xff]   ;;  %v981_v21 = vld [vmem:[#allocation5 + $0x98] ss:$12 sps:$4 sm:$0xff]   ;;  %v982_v22 = vld [vmem:[#allocation5 + $0x90] ss:$12 sps:$4 sm:$0xff]  }
  0x64   :  { %906 = vmatprep.subr.bf16.mxu1 %v965_v8  ;;  %918 = vmatprep.mubr.bf16.mxu1 %v987_v19  ;;  %v983_v23 = vld [vmem:[#allocation5 + $0xac] ss:$12 sps:$4 sm:$0xff]   ;;  %v985_v24 = vld [vmem:[#allocation5 + $0xb0] ss:$12 sps:$4 sm:$0xff]   ;;  %v986_v25 = vld [vmem:[#allocation5 + $0xa8] ss:$12 sps:$4 sm:$0xff]  }
  0x65   :  { %v989_v27 = vld [vmem:[#allocation8 + $0x40] sm:$0xff]   ;;  %v992_v30 = vld [vmem:[#allocation8 + $0x48] sm:$0xff]   ;;  %v995_v33 = vld [vmem:[#allocation8 + $0x50] sm:$0xff]   ;;  %v126_v53 = vsub.s32 0, %v125_v52  ;;  %v134_v54 = vsub.s32 2, %v125_v52  ;;  %v130_v56 = vsub.s32 1, %v125_v52 }
  0x66   :  { %284 = vmatpush1.bf16.msra.mxu0 %v966_v9  ;;  %v990_v28 = vld [vmem:[#allocation8 + $0x80] sm:$0xff]   ;;  %v993_v31 = vld [vmem:[#allocation8 + $0x88] sm:$0xff]   ;;  %v996_v34 = vld [vmem:[#allocation8 + $0x90] sm:$0xff]   ;;  %s1227_s4 = smov [#allocation11]  }
  0x67   :  { %907 = vmatpush3.bf16.msra.mxu1 %v965_v8  ;;  %285 = vmatprep.subr.bf16.mxu0 %v967_v10  ;;  %v991_v29 = vld [vmem:[#allocation8] sm:$0xff]   ;;  %v994_v32 = vld [vmem:[#allocation8 + $0x8] sm:$0xff]   ;;  %v997_v35 = vld [vmem:[#allocation8 + $0x10] sm:$0xff]   ;;  %s789_s29 = sshll.u32 %s1227_s4, 4  ;;  %s790_s29 = int_to_ptr.vmem [resolvable:$true] %s789_s29 }
  0x68   :  { %908 = vmatprep.subr.bf16.mxu1 %v969_v11  ;;  %v998_v36 = vld [vmem:[#allocation8 + $0x58] sm:$0xff]   ;;  %v1001_v39 = vld [vmem:[#allocation8 + $0x60] sm:$0xff]   ;;  %v1004_v42 = vld [vmem:[#allocation8 + $0x68] sm:$0xff]   ;;  %s1187_s3 = scalar_lea.vmem %s790_s29, 512  ;;  %p1192_p13 = scmp.lt.s32.totalorder %s790_s29, %s790_s29 }
  0x69   :  { %v999_v37 = vld [vmem:[#allocation8 + $0x98] sm:$0xff]   ;;  %v1002_v40 = vld [vmem:[#allocation8 + $0xa0] sm:$0xff]   ;;  %v1005_v43 = vld [vmem:[#allocation8 + $0xa8] sm:$0xff]   ;;  %p1188_p12 = scmp.ne.s32.totalorder %s790_s29, %s1187_s3  ;;  %p1193_p0 = scmp.lt.s32.totalorder %s1187_s3, %s1187_s3 }
  0x6a   :  { %286 = vmatpush1.bf16.msra.mxu0 %v970_v12  ;;  %v1000_v38 = vld [vmem:[#allocation8 + $0x18] sm:$0xff]   ;;  %v1003_v41 = vld [vmem:[#allocation8 + $0x20] sm:$0xff]   ;;  %v1006_v44 = vld [vmem:[#allocation8 + $0x28] sm:$0xff]  }
  0x6b   :  { %909 = vmatpush3.bf16.msra.mxu1 %v969_v11  ;;  %287 = vmatprep.subr.bf16.mxu0 %v971_v13  ;;  %v1007_v45 = vld [vmem:[#allocation8 + $0x70] sm:$0xff]   ;;  %v1010_v48 = vld [vmem:[#allocation8 + $0x78] sm:$0xff]   ;;  %p1194_p1 = por %p1193_p0, %p1192_p13 }
  0x6c   :  { %910 = vmatprep.subr.bf16.mxu1 %v973_v14  ;;  %v1008_v46 = vld [vmem:[#allocation8 + $0xb0] sm:$0xff]   ;;  %v1011_v49 = vld [vmem:[#allocation8 + $0xb8] sm:$0xff]  }
  0x6d   :  { %v1009_v47 = vld [vmem:[#allocation8 + $0x30] sm:$0xff]   ;;  %v1012_v50 = vld [vmem:[#allocation8 + $0x38] sm:$0xff]   ;;  %p1195_p2 = pnand %p1194_p1, %p1188_p12 }
  0x6e   :  { %288 = vmatpush1.bf16.msra.mxu0 %v974_v15  ;;  %v122_v55 = vld [vmem:[#allocation7] sm:$0x7] }
  0x6f   :  { %911 = vmatpush3.bf16.msra.mxu1 %v973_v14  ;;  %289 = vmatprep.subr.bf16.mxu0 %v975_v16  ;;  %v127_v57 = vrot.slane %v122_v55, %v126_v53  ;;  %v135_v58 = vrot.slane %v122_v55, %v134_v54  ;;  %v131_v59 = vrot.slane %v122_v55, %v130_v56 }
  0x70   :  { %912 = vmatprep.subr.bf16.mxu1 %v977_v17 }
  0x72   :  { %290 = vmatpush1.bf16.msra.mxu0 %v978_v18 }
  0x73   :  { %913 = vmatpush3.bf16.msra.mxu1 %v977_v17  ;;  %291 = vmatprep.subr.bf16.mxu0 %v979_v20 }
  0x74   :  { %914 = vmatprep.subr.bf16.mxu1 %v981_v21 }
  0x76   :  { %292 = vmatpush1.bf16.msra.mxu0 %v982_v22 }
  0x77   :  { %915 = vmatpush3.bf16.msra.mxu1 %v981_v21  ;;  %293 = vmatprep.subr.bf16.mxu0 %v983_v23 }
  0x78   :  { %916 = vmatprep.subr.bf16.mxu1 %v985_v24 }
  0x7a   :  { %294 = vmatpush1.bf16.msra.mxu0 %v986_v25 }
  0x7b   :  { %917 = vmatpush3.bf16.msra.mxu1 %v985_v24  ;;  %864 = vmatprep.subr.bf16.mxu0 %v989_v27 }
  0x7c   :  { %922 = vmatprep.subr.bf16.mxu1 %v990_v28 }
  0x7d   :  { %312 = vmatmul.mubr.bf16.vlgmr.msra.gmra.mrb[0].mxu0 %v987_v19 }
  0x7e   :  { %919 = vmatmul.mubr.bf16.vlgmr.msra.gmra.mrb[0].mxu1 %v988_v26  ;;  %321 = vmatprep.mubr.bf16.mxu0 %v1226_v0 }
  0x7f   :  { %865 = vmatpush3.bf16.msra.mxu0 %v991_v29  ;;  %923 = vmatpush3.bf16.msra.mxu1 %v990_v28 }
  0x80   :  { %866 = vmatprep.subr.bf16.mxu0 %v992_v30  ;;  %924 = vmatprep.subr.bf16.mxu1 %v993_v31 }
  0x83   :  { %867 = vmatpush3.bf16.msra.mxu0 %v994_v32  ;;  %925 = vmatpush3.bf16.msra.mxu1 %v993_v31 }
  0x84   :  { %868 = vmatprep.subr.bf16.mxu0 %v995_v33  ;;  %926 = vmatprep.subr.bf16.mxu1 %v996_v34 }
  0x85   :  { %322 = vmatmul.mubr.bf16.gmra.mrb[4].mxu0 %v988_v26 }
  0x87   :  { %869 = vmatpush3.bf16.msra.mxu0 %v997_v35  ;;  %927 = vmatpush3.bf16.msra.mxu1 %v996_v34 }
  0x88   :  { %870 = vmatprep.subr.bf16.mxu0 %v998_v36  ;;  %928 = vmatprep.subr.bf16.mxu1 %v999_v37 }
  0x8b   :  { %871 = vmatpush3.bf16.msra.mxu0 %v1000_v38  ;;  %929 = vmatpush3.bf16.msra.mxu1 %v999_v37 }
  0x8c   :  { %872 = vmatprep.subr.bf16.mxu0 %v1001_v39  ;;  %930 = vmatprep.subr.bf16.mxu1 %v1002_v40 }
  0x8f   :  { %873 = vmatpush3.bf16.msra.mxu0 %v1003_v41  ;;  %931 = vmatpush3.bf16.msra.mxu1 %v1002_v40 }
  0x90   :  { %874 = vmatprep.subr.bf16.mxu0 %v1004_v42  ;;  %932 = vmatprep.subr.bf16.mxu1 %v1005_v43 }
  0x93   :  { %875 = vmatpush3.bf16.msra.mxu0 %v1006_v44  ;;  %933 = vmatpush3.bf16.msra.mxu1 %v1005_v43 }
  0x94   :  { %876 = vmatprep.subr.bf16.mxu0 %v1007_v45  ;;  %934 = vmatprep.subr.bf16.mxu1 %v1008_v46 }
  0x97   :  { %877 = vmatpush3.bf16.msra.mxu0 %v1009_v47  ;;  %935 = vmatpush3.bf16.msra.mxu1 %v1008_v46 }
  0x98   :  { %878 = vmatprep.subr.bf16.mxu0 %v1010_v48  ;;  %936 = vmatprep.subr.bf16.mxu1 %v1011_v49 }
  0x9b   :  { %879 = vmatpush3.bf16.msra.mxu0 %v1012_v50  ;;  %937 = vmatpush3.bf16.msra.mxu1 %v1011_v49 }
 0x150   :  { %v313_v60 = vpop.f32.mrb[0].mxu0 }
 0x151   :  { %v920_v61 = vpop.f32.mrb[0].mxu1  ;;  %v1320_v62 = vadd.f32 %v313_v60, %v127_v57  ;;  %v315_v0 = vpop.f32.mrb[1].mxu0 }
 0x152   :  { %v1322_v63 = vadd.f32 %v920_v61, %v135_v58  ;;  %v366_v1 = vpop.f32.mrb[1].mxu1  ;;  %v1324_v2 = vadd.f32 %v315_v0, %v131_v59  ;;  %v317_v4 = vpop.f32.mrb[2].mxu0 }
 0x153   :  { %v1326_v3 = vadd.f32 %v366_v1, %v135_v58  ;;  %v921_v5 = vpop.f32.mrb[2].mxu1  ;;  %v381_v6 = vsub.f32 0.0, %v1320_v62  ;;  %v1330_v8 = vadd.f32 %v317_v4, %v127_v57  ;;  %v319_v10 = vpop.f32.mrb[3].mxu0 }
 0x154   :  { %v389_v7 = vsub.f32 0.0, %v1322_v63  ;;  %v1332_v9 = vadd.f32 %v921_v5, %v135_v58  ;;  %v369_v11 = vpop.f32.mrb[3].mxu1  ;;  %v382_v12 = vsub.f32 0.0, %v1324_v2  ;;  %v1336_v14 = vadd.f32 %v319_v10, %v131_v59 }
 0x155   :  { %v383_v13 = vsub.f32 0.0, %v1326_v3  ;;  %v1338_v15 = vadd.f32 %v369_v11, %v135_v58  ;;  %v393_v16 = vmul.f32 1.442695, %v381_v6  ;;  %v384_v18 = vsub.f32 0.0, %v1330_v8 }
 0x156   :  { %v409_v17 = vmul.f32 1.442695, %v389_v7  ;;  %v392_v19 = vsub.f32 0.0, %v1332_v9  ;;  %v395_v20 = vmul.f32 1.442695, %v382_v12  ;;  %v385_v22 = vsub.f32 0.0, %v1336_v14 }
 0x157   :  { %v397_v21 = vmul.f32 1.442695, %v383_v13  ;;  %v386_v23 = vsub.f32 0.0, %v1338_v15  ;;  %1013 = vpow2.f32 %v393_v16  ;;  %v399_v24 = vmul.f32 1.442695, %v384_v18 }
 0x158   :  { %1015 = vpow2.f32 %v409_v17  ;;  %v415_v25 = vmul.f32 1.442695, %v392_v19  ;;  %v323_v26 = vpop.f32.mrb[4].mxu0  ;;  %v401_v27 = vmul.f32 1.442695, %v385_v22 }
 0x159   :  { %1017 = vpow2.f32 %v395_v20  ;;  %v1344_v28 = vadd.f32 %v323_v26, %v127_v57  ;;  %v325_v29 = vpop.f32.mrb[5].mxu0  ;;  %v403_v30 = vmul.f32 1.442695, %v386_v23 }
 0x15a   :  { %1019 = vpow2.f32 %v397_v21  ;;  %v1346_v31 = vadd.f32 %v325_v29, %v131_v59  ;;  %v327_v32 = vpop.f32.mrb[6].mxu0 }
 0x15b   :  { %1021 = vpow2.f32 %v399_v24  ;;  %v387_v33 = vsub.f32 0.0, %v1344_v28  ;;  %v1349_v34 = vadd.f32 %v327_v32, %v127_v57  ;;  %v329_v35 = vpop.f32.mrb[7].mxu0 }
 0x15c   :  { %1023 = vpow2.f32 %v415_v25  ;;  %v388_v36 = vsub.f32 0.0, %v1346_v31  ;;  %v1352_v37 = vadd.f32 %v329_v35, %v131_v59 }
 0x15d   :  { %1025 = vpow2.f32 %v401_v27  ;;  %v405_v38 = vmul.f32 1.442695, %v387_v33  ;;  %v390_v39 = vsub.f32 0.0, %v1349_v34 }
 0x15e   :  { %1027 = vpow2.f32 %v403_v30  ;;  %v407_v40 = vmul.f32 1.442695, %v388_v36  ;;  %v391_v41 = vsub.f32 0.0, %v1352_v37 }
 0x15f   :  { %1029 = vpow2.f32 %v405_v38  ;;  %v411_v42 = vmul.f32 1.442695, %v390_v39 }
 0x160   :  { %1031 = vpow2.f32 %v407_v40  ;;  %v413_v43 = vmul.f32 1.442695, %v391_v41  ;;  %v829_v41 = vld [vmem:[#allocation10] ss:$0 sm:$0xff] }
 0x161   :  { %v1014_v44 = vpop.eup %1013  ;;  %1033 = vpow2.f32 %v411_v42 }
 0x162   :  { %v1016_v45 = vpop.eup %1015  ;;  %v417_v46 = vadd.f32 1.0, %v1014_v44  ;;  %1035 = vpow2.f32 %v413_v43 }
 0x163   :  { %v1018_v47 = vpop.eup %1017  ;;  %v425_v48 = vadd.f32 1.0, %v1016_v45 }
 0x164   :  { %v1020_v49 = vpop.eup %1019  ;;  %1037 = vrcp.f32 %v417_v46  ;;  %v418_v50 = vadd.f32 1.0, %v1018_v47 }
 0x165   :  { %v1022_v51 = vpop.eup %1021  ;;  %1039 = vrcp.f32 %v425_v48  ;;  %v419_v52 = vadd.f32 1.0, %v1020_v49 }
 0x166   :  { %v1024_v53 = vpop.eup %1023  ;;  %1041 = vrcp.f32 %v418_v50  ;;  %v420_v54 = vadd.f32 1.0, %v1022_v51 }
 0x167   :  { %v1026_v55 = vpop.eup %1025  ;;  %1043 = vrcp.f32 %v419_v52  ;;  %v428_v56 = vadd.f32 1.0, %v1024_v53 }
 0x168   :  { %v1028_v57 = vpop.eup %1027  ;;  %1045 = vrcp.f32 %v420_v54  ;;  %v421_v58 = vadd.f32 1.0, %v1026_v55 }
 0x169   :  { %v1030_v59 = vpop.eup %1029  ;;  %1047 = vrcp.f32 %v428_v56  ;;  %v422_v60 = vadd.f32 1.0, %v1028_v57 }
 0x16a   :  { %v1032_v61 = vpop.eup %1031  ;;  %1049 = vrcp.f32 %v421_v58  ;;  %v423_v0 = vadd.f32 1.0, %v1030_v59 }
 0x16b   :  { %v1034_v1 = vpop.eup %1033  ;;  %1051 = vrcp.f32 %v422_v60  ;;  %v424_v4 = vadd.f32 1.0, %v1032_v61 }
 0x16c   :  { %v1036_v5 = vpop.eup %1035  ;;  %1053 = vrcp.f32 %v423_v0  ;;  %v426_v6 = vadd.f32 1.0, %v1034_v1 }
 0x16d   :  { %1055 = vrcp.f32 %v424_v4  ;;  %v427_v7 = vadd.f32 1.0, %v1036_v5 }
 0x16e   :  { %v1038_v10 = vpop.eup %1037  ;;  %1057 = vrcp.f32 %v426_v6 }
 0x16f   :  { %v1040_v11 = vpop.eup %1039  ;;  %1059 = vrcp.f32 %v427_v7  ;;  %v441_v18 = vmul.f32 %v1038_v10, %v1320_v62 }
 0x170   :  { %v1042_v12 = vpop.eup %1041  ;;  %v449_v21 = vmul.f32 %v1040_v11, %v1322_v63 }
 0x171   :  { %v1044_v13 = vpop.eup %1043  ;;  %v442_v24 = vmul.f32 %v1042_v12, %v1324_v2 }
 0x172   :  { %v1046_v16 = vpop.eup %1045  ;;  %v443_v29 = vmul.f32 %v1044_v13, %v1326_v3 }
 0x173   :  { %v1048_v17 = vpop.eup %1047  ;;  %v444_v19 = vmul.f32 %v1046_v16, %v1330_v8 }
 0x174   :  { %v1050_v20 = vpop.eup %1049  ;;  %v452_v22 = vmul.f32 %v1048_v17, %v1332_v9 }
 0x175   :  { %v1052_v23 = vpop.eup %1051  ;;  %v453_v25 = vpack.c.bf16 %v444_v19, %v441_v18  ;;  %v445_v26 = vmul.f32 %v1050_v20, %v1336_v14 }
 0x176   :  { %v1054_v27 = vpop.eup %1053  ;;  %v458_v30 = vpack.c.bf16 %v452_v22, %v449_v21  ;;  %v446_v32 = vmul.f32 %v1052_v23, %v1338_v15 }
 0x177   :  { %v1056_v62 = vpop.eup %1055  ;;  %v454_v33 = vpack.c.bf16 %v445_v26, %v442_v24  ;;  %v447_v63 = vmul.f32 %v1054_v27, %v1344_v28 }
 0x178   :  { %v1058_v8 = vpop.eup %1057  ;;  %v455_v35 = vpack.c.bf16 %v446_v32, %v443_v29  ;;  %v448_v2 = vmul.f32 %v1056_v62, %v1346_v31 }
 0x179   :  { %v1060_v36 = vpop.eup %1059  ;;  %v450_v9 = vmul.f32 %v1058_v8, %v1349_v34  ;;  %690 = vmatprep.mubr.bf16.mxu0 %v454_v33 }
 0x17a   :  { %v451_v14 = vmul.f32 %v1060_v36, %v1352_v37  ;;  %938 = vmatprep.mubr.bf16.mxu1 %v455_v35  ;;  %691 = vmatmul.mubr.bf16.vlgmr.msra.gmra.mrb[8].mxu0 %v453_v25 }
 0x17b   :  { %939 = vmatmul.mubr.bf16.vlgmr.msra.gmra.mrb[4].mxu1 %v458_v30  ;;  %v456_v3 = vpack.c.bf16 %v450_v9, %v447_v63 }
 0x17c   :  { %v457_v38 = vpack.c.bf16 %v451_v14, %v448_v2 }
 0x17e   :  { %698 = vmatprep.mubr.bf16.mxu0 %v457_v38 }
 0x182   :  { %699 = vmatmul.mubr.bf16.gmra.mrb[12].mxu0 %v456_v3 }
 0x24d   :  { %v880_v15 = vpop.f32.mrb[8].mxu0 }
 0x24e   :  { %v940_v39 = vpop.f32.mrb[4].mxu1  ;;  %v881_v40 = vpop.f32.mrb[9].mxu0 }
 0x24f   :  { %v882_v42 = vadd.f32 %v881_v40, %v880_v15  ;;  %v741_v28 = vpop.f32.mrb[5].mxu1  ;;  %v883_v43 = vpop.f32.mrb[10].mxu0 }
 0x250   :  { %v941_v34 = vpop.f32.mrb[6].mxu1  ;;  %v884_v44 = vpop.f32.mrb[11].mxu0 }
 0x251   :  { %v693_v45 = vadd.f32 %v882_v42, %v829_v41  ;;  %v885_v31 = vadd.f32 %v884_v44, %v883_v43  ;;  %v744_v46 = vpop.f32.mrb[7].mxu1 }
 0x253   :  { %v742_v37 = vadd.f32 %v741_v28, %v693_v45  ;;  %v696_v47 = vadd.f32 %v885_v31, %v829_v41 }
 0x255   :  { %v756_v48 = vsub.f32 0.0, %v742_v37  ;;  %v745_v49 = vadd.f32 %v744_v46, %v696_v47  ;;  %v886_v50 = vpop.f32.mrb[12].mxu0 }
 0x256   :  { %v887_v51 = vpop.f32.mrb[13].mxu0 }
 0x257   :  { %v760_v52 = vmul.f32 1.442695, %v756_v48  ;;  %v757_v53 = vsub.f32 0.0, %v745_v49  ;;  %v888_v54 = vadd.f32 %v887_v51, %v886_v50  ;;  %v889_v55 = vpop.f32.mrb[14].mxu0 }
 0x258   :  { %v890_v56 = vpop.f32.mrb[15].mxu0 }
 0x259   :  { %1061 = vpow2.f32 %v760_v52  ;;  %v762_v57 = vmul.f32 1.442695, %v757_v53  ;;  %v701_v58 = vadd.f32 %v888_v54, %v829_v41  ;;  %v891_v59 = vadd.f32 %v890_v56, %v889_v55 }
 0x25b   :  { %1063 = vpow2.f32 %v762_v57  ;;  %v750_v60 = vadd.f32 %v940_v39, %v701_v58  ;;  %v704_v61 = vadd.f32 %v891_v59, %v829_v41 }
 0x25d   :  { %v758_v0 = vsub.f32 0.0, %v750_v60  ;;  %v753_v1 = vadd.f32 %v941_v34, %v704_v61 }
 0x25f   :  { %v764_v4 = vmul.f32 1.442695, %v758_v0  ;;  %v759_v5 = vsub.f32 0.0, %v753_v1 }
 0x261   :  { %1065 = vpow2.f32 %v764_v4  ;;  %v766_v6 = vmul.f32 1.442695, %v759_v5 }
 0x263   :  { %v1062_v7 = vpop.eup %1061  ;;  %1067 = vpow2.f32 %v766_v6 }
 0x264   :  { %v768_v10 = vadd.f32 1.0, %v1062_v7 }
 0x265   :  { %v1064_v11 = vpop.eup %1063 }
 0x266   :  { %1069 = vrcp.f32 %v768_v10  ;;  %v769_v12 = vadd.f32 1.0, %v1064_v11 }
 0x268   :  { %1071 = vrcp.f32 %v769_v12 }
 0x26b   :  { %v1066_v13 = vpop.eup %1065 }
 0x26c   :  { %v770_v16 = vadd.f32 1.0, %v1066_v13 }
 0x26d   :  { %v1068_v17 = vpop.eup %1067 }
 0x26e   :  { %1073 = vrcp.f32 %v770_v16  ;;  %v771_v18 = vadd.f32 1.0, %v1068_v17 }
 0x270   :  { %v1070_v19 = vpop.eup %1069  ;;  %1075 = vrcp.f32 %v771_v18 }
 0x271   :  { %v776_v20 = vmul.f32 %v1070_v19, %v742_v37 }
 0x272   :  { %v1072_v21 = vpop.eup %1071 }
 0x273   :  { %780 = vst [vmem:[#allocation11] sm:$0xff] %v776_v20  ;;  %v777_v22 = vmul.f32 %v1072_v21, %v745_v49 }
 0x275   :  { %781 = vst [vmem:[#allocation11 + $0x8] sm:$0xff] %v777_v22 }
 0x278   :  { %v1074_v23 = vpop.eup %1073 }
 0x279   :  { %v778_v24 = vmul.f32 %v1074_v23, %v750_v60 }
 0x27a   :  { %v1076_v25 = vpop.eup %1075 }
 0x27b   :  { %782 = vst [vmem:[#allocation11 + $0x10] sm:$0xff] %v778_v24  ;;  %v779_v26 = vmul.f32 %v1076_v25, %v753_v1 }
 0x27d   :  { %783 = vst [vmem:[#allocation11 + $0x18] sm:$0xff] %v779_v26 }
 0x27e   :  { %1198 = shalt.err (!%p1195_p2)
}
 0x27f   :  { %s1199_s7 = scalar_lea.hbm %s1385_s5, 512 }
 0x280   :  { %p1200_p3 = scmp.ne.s32.totalorder %s1385_s5, %s1199_s7  ;;  %p1203_p4 = scmp.lt.u32.totalorder %s1199_s7, %s1385_s5 }
 0x282   :  { %p1205_p5 = pnand %p1203_p4, %p1200_p3 }
 0x284   :  { %1208 = shalt.err (!%p1205_p5)
}
 0x285   :  { %s1228_s13 = smov 128   ;;  %s1229_s14 = smov 8  }
 0x286   :  { %795 = dma.vmem_to_hbm [thread:$0]  %s790_s29, 512, %s1385_s5, [#allocation4], %s1228_s13, %s1228_s13, %s1229_s14  }
 0x287   :  { %1215 = dma.done.wait [#allocation4], 512  }
 0x288   :  { %1216 = vsyncadd [#allocation4], 4294966784 }
 0x289   :  { %799 = vsyncpa [#allocation3], 1 }
 0x28a   :  { %800 = vsyncpa [#allocation6], 1 }
 0x28b   :  { %801 = vsyncpa [#allocation9], 1 }
 0x28c   :  { %802 = vsyncpa [#allocation4], 1 }

</bundles_post_ra>
